<compile_context>
chip_gen: v7x
topology: tpu7x:2x2x1
jax: 0.10.0
libtpu: 0.0.40
codegen_flags: <defaults>
</compile_context>

<pallas_src>
import functools

import jax
import jax.numpy as jnp
from jax import lax
from jax.experimental import pallas as pl
from jax.experimental.pallas import tpu as pltpu


def _round_up(v, m):
    return ((v + m - 1) // m) * m


def _sublane_multiple(dtype):
    # Native (sublane, lane) tile is (8,128) for 4-byte, (16,128) for 2-byte,
    # (32,128) for 1-byte dtypes.
    return {4: 8, 2: 16, 1: 32}.get(jnp.dtype(dtype).itemsize, 8)


def _pick_tile_k(in_dim, tile_k_max, tile_k_min=512):
    """Choose the K tile without ever padding x / weight in HBM.

    Returns (tile_k, k_rem): k_rem == 0 means every K tile is full; k_rem > 0
    means the last K tile only has `k_rem` valid columns (masked in-kernel).
    """
    if in_dim <= tile_k_max:
        return in_dim, 0                      # single full-K step
    best = 0
    if in_dim % 128 == 0:
        q = in_dim // 128
        for d in range(min(q, tile_k_max // 128), 0, -1):
            if q % d == 0:
                best = 128 * d
                break
    if best >= tile_k_min:
        return best, 0                        # exact 128-aligned divisor
    tile_k = max(128, (tile_k_max // 128) * 128)
    return tile_k, in_dim % tile_k            # masked trailing partial K tile


def _fc_out_kernel(x_ref, w_ref, b_ref, o_ref, acc_ref, *, k_rem):
    """One (tile_m, tile_n) output tile, accumulated over the K grid axis.

    x_ref:   (tile_m, tile_k)          activation tile
    w_ref:   (tile_n, tile_k)          weight tile (PyTorch [out_dim, in_dim])
    b_ref:   (1, tile_n)               bias tile
    o_ref:   (tile_m, tile_n)          output tile
    acc_ref: (tile_m, tile_n) float32  VMEM accumulator scratch
    """
    k = pl.program_id(2)
    n_k = pl.num_programs(2)

    @pl.when(k == 0)
    def _():
        # Seed the accumulator with the bias: the finalize branch then is a
        # single cast + store (no separate full-tile add pass).
        acc_ref[...] = jnp.broadcast_to(
            b_ref[...].astype(jnp.float32), acc_ref.shape)

    # Contract the last dims of both operands (x @ w.T) -> MXU NT matmul, no
    # transpose materialized (same pattern as q @ k.T in flash attention).
    nt_dims = (((1,), (1,)), ((), ()))

    if k_rem:
        # in_dim is not a multiple of tile_k: the last K tile extends past the
        # end of x / weight, so its invalid columns hold unspecified data and
        # must be zeroed before hitting the MXU.  Only the last step pays.
        is_last = k == n_k - 1

        @pl.when(jnp.logical_not(is_last))
        def _():
            acc_ref[...] += lax.dot_general(
                x_ref[...], w_ref[...], dimension_numbers=nt_dims,
                preferred_element_type=jnp.float32)

        @pl.when(is_last)
        def _():
            xcol = lax.broadcasted_iota(jnp.int32, x_ref.shape, 1)
            wcol = lax.broadcasted_iota(jnp.int32, w_ref.shape, 1)
            x = jnp.where(xcol < k_rem, x_ref[...], 0)
            w = jnp.where(wcol < k_rem, w_ref[...], 0)
            acc_ref[...] += lax.dot_general(
                x, w, dimension_numbers=nt_dims,
                preferred_element_type=jnp.float32)
    else:
        acc_ref[...] += lax.dot_general(
            x_ref[...], w_ref[...], dimension_numbers=nt_dims,
            preferred_element_type=jnp.float32)

    @pl.when(k == n_k - 1)
    def _():
        o_ref[...] = acc_ref[...].astype(o_ref.dtype)


def _fc_out_2d(x, weight, bias, *, tile_m, tile_n, tile_k, weight_buffers):
    n_rows, in_dim = x.shape
    out_dim, in_dim_w = weight.shape
    assert in_dim_w == in_dim, "weight / activation in_dim mismatch"
    assert bias.shape == (out_dim,), "bias shape mismatch"

    # --- tile selection ------------------------------------------------------
    sub = _sublane_multiple(x.dtype)
    tile_m = int(min(tile_m, _round_up(n_rows, sub)))
    tile_n = int(min(tile_n, _round_up(out_dim, 128)))   # lane-dense output
    tile_k, k_rem = _pick_tile_k(in_dim, int(tile_k))

    grid = (pl.cdiv(n_rows, tile_m), pl.cdiv(out_dim, tile_n),
            pl.cdiv(in_dim, tile_k))

    b2d = bias.reshape(1, out_dim)

    # --- generation-aware VMEM budget ----------------------------------------
    x_b = jnp.dtype(x.dtype).itemsize
    w_b = jnp.dtype(weight.dtype).itemsize
    b_b = jnp.dtype(bias.dtype).itemsize
    wb = max(2, int(weight_buffers))
    vmem_est = (
        2 * tile_m * tile_k * x_b          # x (double-buffered)
        + wb * tile_n * tile_k * w_b       # weight (wb-deep buffered)
        + 2 * 8 * tile_n * b_b             # bias tile (pads to 8 sublanes)
        + 2 * tile_m * tile_n * x_b        # output
        + tile_m * tile_n * 4              # f32 accumulator scratch
    )
    try:
        vmem_cap = int(getattr(pltpu.get_tpu_info(), "vmem_capacity_bytes",
                               64 << 20))
    except Exception:
        vmem_cap = 64 << 20                # assume most constrained gen (v7x)
    vmem_limit = int(min(max(2 * vmem_est, 32 << 20), (vmem_cap * 3) // 4))

    w_spec_kwargs = {}
    if wb != 2:
        # Deeper weight prefetch for weight-streaming-bound shapes.
        w_spec_kwargs["pipeline_mode"] = pl.Buffered(wb)
    w_spec = pl.BlockSpec((tile_n, tile_k), lambda i, j, k: (j, k),
                          **w_spec_kwargs)

    return pl.pallas_call(
        functools.partial(_fc_out_kernel, k_rem=k_rem),
        out_shape=jax.ShapeDtypeStruct((n_rows, out_dim), x.dtype),
        grid_spec=pltpu.PrefetchScalarGridSpec(
            num_scalar_prefetch=0,
            grid=grid,
            in_specs=[
                pl.BlockSpec((tile_m, tile_k), lambda i, j, k: (i, k)),  # x
                w_spec,                                                  # weight
                pl.BlockSpec((1, tile_n), lambda i, j, k: (0, j)),       # bias
            ],
            out_specs=pl.BlockSpec((tile_m, tile_n), lambda i, j, k: (i, j)),
            scratch_shapes=[pltpu.VMEM((tile_m, tile_n), jnp.float32)],
        ),
        compiler_params=pltpu.CompilerParams(
            dimension_semantics=("parallel", "parallel", "arbitrary"),
            vmem_limit_bytes=vmem_limit,
        ),
    )(x, weight, b2d)


def fc_out(x, weight, bias, *, tile_m=512, tile_n=512, tile_k=2048,
           weight_buffers=2):
    """FCOut forward: y = x @ weight.T + bias (PyTorch nn.Linear semantics).

    x:      [..., in_dim]
    weight: [out_dim, in_dim]  (PyTorch layout; never transposed in HBM)
    bias:   [out_dim]
    """
    in_dim = x.shape[-1]
    out_dim = weight.shape[0]
    lead = x.shape[:-1]
    x2d = x.reshape(-1, in_dim)
    y2d = _fc_out_2d(x2d, weight, bias, tile_m=tile_m, tile_n=tile_n,
                     tile_k=tile_k, weight_buffers=weight_buffers)
    return y2d.reshape(*lead, out_dim)


if __name__ == "__main__":
    root = jax.random.PRNGKey(0)

    def make_case(key, n, in_dim, out_dim):
        kx, kw, kb = jax.random.split(key, 3)
        x = jax.random.normal(kx, (n, in_dim), dtype=jnp.float32)
        bound = 1.0 / (in_dim ** 0.5)
        w = jax.random.uniform(kw, (out_dim, in_dim), jnp.float32, -bound, bound)
        b = jax.random.uniform(kb, (out_dim,), jnp.float32, -bound, bound)
        return x, w, b

    def check(x, w, b):
        y = jax.block_until_ready(fc_out(x, w, b))
        y_ref = jnp.dot(x, w.T, precision=lax.Precision.HIGHEST) + b
        assert y.shape == y_ref.shape, (y.shape, y_ref.shape)
        max_err = float(jnp.max(jnp.abs(y - y_ref)))
        assert jnp.allclose(y, y_ref, atol=2e-2, rtol=2e-2), max_err

    k1, k2, k3 = jax.random.split(root, 3)
    # Small shape consistent with the module (batch=8, in_dim=32, out_dim=16).
    check(*make_case(k1, 8, 32, 16))
    # M/N edge blocks + multi-step K with a masked trailing partial K tile.
    check(*make_case(k2, 300, 2348, 200))
    # Multi-step K with an exact 128-aligned divisor (no masking).
    check(*make_case(k3, 64, 4096, 384))

    print("KERNEL_OK")
</pallas_src>

<mosaic_0001>
module attributes {stable_mosaic.version = 11 : i64} {
  func.func @_fc_out_kernel(%arg0: i32, %arg1: i32, %arg2: i32, %arg3: memref<8x32xf32, #tpu.memory_space<vmem>>, %arg4: memref<128x32xf32, #tpu.memory_space<vmem>>, %arg5: memref<1x128xf32, #tpu.memory_space<vmem>>, %arg6: memref<8x128xf32, #tpu.memory_space<vmem>>, %arg7: memref<8x128xf32, #tpu.memory_space<vmem>>) attributes {dimension_semantics = [#tpu.dimension_semantics<parallel>, #tpu.dimension_semantics<parallel>, #tpu.dimension_semantics<arbitrary>], iteration_bounds = array<i64: 1, 1, 1>, scalar_prefetch = 0 : i64, scratch_operands = 1 : i64, tpu.core_type = #tpu.core_type<tc>, window_params = [{transform_indices = @transform_0, window_bounds = array<i64: 8, 32>}, {transform_indices = @transform_1, window_bounds = array<i64: 128, 32>}, {transform_indices = @transform_2, window_bounds = array<i64: 1, 128>}, {transform_indices = @transform_3, window_bounds = array<i64: 8, 128>}]} {
    %c0_i32 = arith.constant 0 : i32
    %0 = arith.cmpi eq, %arg2, %c0_i32 : i32
    %1 = arith.extui %0 : i1 to i32
    %c0_i32_0 = arith.constant 0 : i32
    %2 = arith.cmpi ne, %1, %c0_i32_0 : i32
    scf.if %2 {
      %c0_10 = arith.constant 0 : index
      %c0_11 = arith.constant 0 : index
      %12 = vector.load %arg5[%c0_10, %c0_11] : memref<1x128xf32, #tpu.memory_space<vmem>>, vector<1x128xf32>
      %13 = vector.shape_cast %12 : vector<1x128xf32> to vector<1x128xf32>
      %14 = vector.broadcast %13 : vector<1x128xf32> to vector<8x128xf32>
      %c0_12 = arith.constant 0 : index
      %c0_13 = arith.constant 0 : index
      %15 = vector.load %arg7[%c0_12, %c0_13] : memref<8x128xf32, #tpu.memory_space<vmem>>, vector<8x128xf32>
      tpu.vector_store %arg7[%c0_12, %c0_13], %14 {strides = array<i32>} : memref<8x128xf32, #tpu.memory_space<vmem>>, vector<8x128xf32>,
    } else {
    }
    %c0 = arith.constant 0 : index
    %c0_1 = arith.constant 0 : index
    %3 = vector.load %arg7[%c0, %c0_1] : memref<8x128xf32, #tpu.memory_space<vmem>>, vector<8x128xf32>
    %c0_2 = arith.constant 0 : index
    %c0_3 = arith.constant 0 : index
    %4 = vector.load %arg3[%c0_2, %c0_3] : memref<8x32xf32, #tpu.memory_space<vmem>>, vector<8x32xf32>
    %c0_4 = arith.constant 0 : index
    %c0_5 = arith.constant 0 : index
    %5 = vector.load %arg4[%c0_4, %c0_5] : memref<128x32xf32, #tpu.memory_space<vmem>>, vector<128x32xf32>
    %cst = arith.constant dense<0.000000e+00> : vector<8x128xf32>
    %6 = tpu.matmul %4, %5, %cst {dimension_numbers = #tpu.dot_dimension_numbers<[1], [1], [0], [0], [0, 0, 1, 0], [], []>} : vector<8x32xf32>, vector<128x32xf32>, vector<8x128xf32> -> vector<8x128xf32>
    %7 = arith.addf %3, %6 : vector<8x128xf32>
    %c0_6 = arith.constant 0 : index
    %c0_7 = arith.constant 0 : index
    %8 = vector.load %arg7[%c0_6, %c0_7] : memref<8x128xf32, #tpu.memory_space<vmem>>, vector<8x128xf32>
    tpu.vector_store %arg7[%c0_6, %c0_7], %7 {strides = array<i32>} : memref<8x128xf32, #tpu.memory_space<vmem>>, vector<8x128xf32>,
    %c0_i32_8 = arith.constant 0 : i32
    %9 = arith.cmpi eq, %arg2, %c0_i32_8 : i32
    %10 = arith.extui %9 : i1 to i32
    %c0_i32_9 = arith.constant 0 : i32
    %11 = arith.cmpi ne, %10, %c0_i32_9 : i32
    scf.if %11 {
      %c0_10 = arith.constant 0 : index
      %c0_11 = arith.constant 0 : index
      %12 = vector.load %arg7[%c0_10, %c0_11] : memref<8x128xf32, #tpu.memory_space<vmem>>, vector<8x128xf32>
      %c0_12 = arith.constant 0 : index
      %c0_13 = arith.constant 0 : index
      %13 = vector.load %arg6[%c0_12, %c0_13] : memref<8x128xf32, #tpu.memory_space<vmem>>, vector<8x128xf32>
      tpu.vector_store %arg6[%c0_12, %c0_13], %12 {strides = array<i32>} : memref<8x128xf32, #tpu.memory_space<vmem>>, vector<8x128xf32>,
    } else {
    }
    return
  }
  func.func @transform_0(%arg0: i32, %arg1: i32, %arg2: i32) -> (i32, i32) {
    %c0_i32 = arith.constant 0 : i32
    return %arg0, %arg2 : i32, i32
  }
  func.func @transform_1(%arg0: i32, %arg1: i32, %arg2: i32) -> (i32, i32) {
    %c0_i32 = arith.constant 0 : i32
    return %arg1, %arg2 : i32, i32
  }
  func.func @transform_2(%arg0: i32, %arg1: i32, %arg2: i32) -> (i32, i32) {
    %c0_i32 = arith.constant 0 : i32
    %c0_i32_0 = arith.constant 0 : i32
    return %c0_i32, %arg1 : i32, i32
  }
  func.func @transform_3(%arg0: i32, %arg1: i32, %arg2: i32) -> (i32, i32) {
    %c0_i32 = arith.constant 0 : i32
    return %arg0, %arg1 : i32, i32
  }
}

</mosaic_0001>

<bundles_post_ra>
// kernel: tpu_custom_call.1
= control target key start
LH: loop header
LB: loop body
LE: loop exit
PB: predicated region body
PF: predicated region fallthrough
CT: control target
= control target key end

     0   :  { %8 = vsyncpa [#allocation4], 0  ;;  %s488_s0 = inlined_call_operand.hbm [shape: f32[8,32], index: 0, kind: input, shape index: {}]   ;;  %s489_s1 = inlined_call_operand.hbm [shape: f32[16,32], index: 1, kind: input, shape index: {}]   ;;  %s490_s2 = inlined_call_operand.vmem [shape: f32[1,16], index: 2, kind: input, shape index: {}]   ;;  %s491_s3 = inlined_call_operand.hbm [shape: f32[8,16], index: 3, kind: output, shape index: {}]  }
   0x1   :  { %9 = vsyncpa [#allocation7], 0 }
   0x2   :  { %10 = vsyncpa [#allocation5], 0  ;;  %s398_s12 = smov [#allocation3]   ;;  %s326_s16 = scalar_lea.hbm %s488_s0, 128 }
   0x3   :  { %s17_s13 = sshll.u32 %s398_s12, 4  ;;  %p327_p0 = scmp.ne.s32.totalorder %s488_s0, %s326_s16  ;;  %s18_s13 = int_to_ptr.vmem [resolvable:$true] %s17_s13 }
   0x4   :  { %p330_p1 = scmp.lt.u32.totalorder %s326_s16, %s488_s0 }
   0x6   :  { %p332_p2 = pnand %p330_p1, %p327_p0 }
   0x8   :  { %335 = shalt.err (!%p332_p2)
}
   0x9   :  { %s336_s21 = scalar_lea.vmem %s18_s13, 128  ;;  %p341_p4 = scmp.lt.s32.totalorder %s18_s13, %s18_s13 }
   0xa   :  { %p337_p3 = scmp.ne.s32.totalorder %s18_s13, %s336_s21  ;;  %p342_p5 = scmp.lt.s32.totalorder %s336_s21, %s336_s21 }
   0xc   :  { %p343_p6 = por %p342_p5, %p341_p4 }
   0xe   :  { %p344_p7 = pnand %p343_p6, %p337_p3 }
  0x10   :  { %347 = shalt.err (!%p344_p7)
}
  0x11   :  { %20 = dma.hbm_to_vmem [thread:$0]  %s488_s0, 128, %s18_s13, [#allocation4]  }
  0x12   :  { %25 = vsyncadd [#allocation7], 1792  ;;  %s399_s24 = smov [#allocation6]   ;;  %s348_s28 = scalar_lea.hbm %s489_s1, 256 }
  0x13   :  { %s26_s25 = sshll.u32 %s399_s24, 4  ;;  %p349_p8 = scmp.ne.s32.totalorder %s489_s1, %s348_s28  ;;  %s27_s25 = int_to_ptr.vmem [resolvable:$true] %s26_s25 }
  0x14   :  { %p352_p9 = scmp.lt.u32.totalorder %s348_s28, %s489_s1 }
  0x16   :  { %p354_p10 = pnand %p352_p9, %p349_p8 }
  0x18   :  { %357 = shalt.err (!%p354_p10)
}
  0x19   :  { %s358_s6 = scalar_lea.vmem %s27_s25, 256  ;;  %s362_s0 = scalar_lea.vmem %s27_s25, 2048 }
  0x1a   :  { %p359_p11 = scmp.ne.s32.totalorder %s27_s25, %s358_s6  ;;  %p363_p12 = scmp.lt.s32.totalorder %s27_s25, %s27_s25 }
  0x1b   :  { %p364_p13 = scmp.lt.s32.totalorder %s362_s0, %s358_s6 }
  0x1d   :  { %p365_p0 = por %p364_p13, %p363_p12 }
  0x1f   :  { %p366_p1 = pnand %p365_p0, %p359_p11 }
  0x21   :  { %369 = shalt.err (!%p366_p1)
}
  0x22   :  { %s400_s7 = smov 128   ;;  %s401_s8 = smov 8  }
  0x23   :  { %32 = dma.hbm_to_vmem [thread:$0]  %s489_s1, 256, %s27_s25, [#allocation7], %s400_s7, %s400_s7, %s401_s8  }
  0x24   :  { %392 = dma.done.wait [#allocation4], 128  }
  0x25   :  { %393 = vsyncadd [#allocation4], 4294967168 }
  0x26   :  { %394 = dma.done.wait [#allocation7], 2048  }
  0x27   :  { %395 = vsyncadd [#allocation7], 4294965248  ;;  %v402_v0 = vmov 0.0|0.0   ;;  %vm403_vm0 = vmmov 0   ;;  %v404_v1 = vmov 0.0   ;;  %vm71_vm1 = vcmask 261120  }
  0x28   :  { %286 = vmatprep.subr.bf16.mxu0 %v402_v0  ;;  %283 = vmatprep.mubr.msk.f32.mxu0 %vm403_vm0, %v404_v1  ;;  %v55_v2 = vld [vmem:[#allocation6] sm:$0xff]  ;;  %v56_v3 = vld [vmem:[#allocation6 + $0x8] sm:$0xff]  ;;  %vm452_vm2 = vmpackc.low %vm71_vm1, %vm71_vm1  ;;  %s405_s12 = smov [#allocation8]  }
  0x29   :  { %v287_v5 = vpack.c.bf16 %v56_v3, %v55_v2  ;;  %v57_v6 = vld [vmem:[#allocation6 + $0x10] sm:$0xff]  ;;  %v58_v7 = vld [vmem:[#allocation6 + $0x18] sm:$0xff]  ;;  %v59_v9 = vld [vmem:[#allocation6 + $0x20] sm:$0xff]  ;;  %s206_s13 = sshll.u32 %s405_s12, 4  ;;  %s207_s13 = int_to_ptr.vmem [resolvable:$true] %s206_s13 }
  0x2a   :  { %v291_v8 = vpack.c.bf16 %v58_v7, %v57_v6  ;;  %v60_v10 = vld [vmem:[#allocation6 + $0x28] sm:$0xff]  ;;  %v61_v12 = vld [vmem:[#allocation6 + $0x30] sm:$0xff]  ;;  %v62_v13 = vld [vmem:[#allocation6 + $0x38] sm:$0xff]  ;;  %s370_s14 = scalar_lea.vmem %s207_s13, 128  ;;  %p375_p3 = scmp.lt.s32.totalorder %s207_s13, %s207_s13 }
  0x2b   :  { %289 = vmatpush3.bf16.xpose.msk.msra.mxu0 %vm452_vm2, %v287_v5  ;;  %v295_v11 = vpack.c.bf16 %v60_v10, %v59_v9  ;;  %v299_v14 = vpack.c.bf16 %v62_v13, %v61_v12  ;;  %v63_v15 = vld [vmem:[#allocation6 + $0x40] sm:$0xff]  ;;  %v64_v16 = vld [vmem:[#allocation6 + $0x48] sm:$0xff]  ;;  %v65_v18 = vld [vmem:[#allocation6 + $0x50] sm:$0xff]  ;;  %p371_p2 = scmp.ne.s32.totalorder %s207_s13, %s370_s14  ;;  %p376_p4 = scmp.lt.s32.totalorder %s370_s14, %s370_s14 }
  0x2c   :  { %290 = vmatprep.subr.bf16.mxu0 %v402_v0  ;;  %v303_v17 = vpack.c.bf16 %v64_v16, %v63_v15  ;;  %v66_v19 = vld [vmem:[#allocation6 + $0x58] sm:$0xff]  ;;  %v67_v21 = vld [vmem:[#allocation6 + $0x60] sm:$0xff]  ;;  %v68_v22 = vld [vmem:[#allocation6 + $0x68] sm:$0xff] }
  0x2d   :  { %v307_v20 = vpack.c.bf16 %v66_v19, %v65_v18  ;;  %v311_v23 = vpack.c.bf16 %v68_v22, %v67_v21  ;;  %v69_v24 = vld [vmem:[#allocation6 + $0x70] sm:$0xff]  ;;  %v70_v25 = vld [vmem:[#allocation6 + $0x78] sm:$0xff]  ;;  %p377_p5 = por %p376_p4, %p375_p3 }
  0x2e   :  { %v315_v26 = vpack.c.bf16 %v70_v25, %v69_v24  ;;  %v54_v27 = vld [vmem:[#allocation3] sm:$0xff] }
  0x2f   :  { %v216_v28 = vld [vmem:[%s490_s2] ss:$0 sm:$0xff]  ;;  %p378_p6 = pnand %p377_p5, %p371_p2 }
  0x33   :  { %293 = vmatpush3.bf16.xpose.msk.msra.mxu0 %vm452_vm2, %v291_v8 }
  0x34   :  { %294 = vmatprep.subr.bf16.mxu0 %v402_v0 }
  0x3b   :  { %297 = vmatpush3.bf16.xpose.msk.msra.mxu0 %vm452_vm2, %v295_v11 }
  0x3c   :  { %298 = vmatprep.subr.bf16.mxu0 %v402_v0 }
  0x43   :  { %301 = vmatpush3.bf16.xpose.msk.msra.mxu0 %vm452_vm2, %v299_v14 }
  0x44   :  { %302 = vmatprep.subr.bf16.mxu0 %v402_v0 }
  0x4b   :  { %305 = vmatpush3.bf16.xpose.msk.msra.mxu0 %vm452_vm2, %v303_v17 }
  0x4c   :  { %306 = vmatprep.subr.bf16.mxu0 %v402_v0 }
  0x53   :  { %309 = vmatpush3.bf16.xpose.msk.msra.mxu0 %vm452_vm2, %v307_v20 }
  0x54   :  { %310 = vmatprep.subr.bf16.mxu0 %v402_v0 }
  0x5b   :  { %313 = vmatpush3.bf16.xpose.msk.msra.mxu0 %vm452_vm2, %v311_v23 }
  0x5c   :  { %314 = vmatprep.subr.bf16.mxu0 %v402_v0 }
  0x63   :  { %317 = vmatpush3.bf16.xpose.msk.msra.mxu0 %vm452_vm2, %v315_v26 }
  0x6a   :  { %284 = vmatmul.mubr.msk.f32.vlgmr.msra.gmra.mrb[0].mxu0 %vm71_vm1, %v54_v27 }
 0x13d   :  { %v189_v29 = vpop.f32.mrb[0].mxu0 }
 0x13e   :  { %v193_v30 = vadd.f32 %v216_v28, %v189_v29  ;;  %v285_v31 = vpop.f32.mrb[1].mxu0 }
 0x140   :  { %199 = vst [vmem:[#allocation8] sm:$0xff] %v193_v30 }
 0x141   :  { %381 = shalt.err (!%p378_p6)
}
 0x142   :  { %s382_s17 = scalar_lea.hbm %s491_s3, 128 }
 0x143   :  { %p383_p7 = scmp.ne.s32.totalorder %s491_s3, %s382_s17  ;;  %p386_p8 = scmp.lt.u32.totalorder %s382_s17, %s491_s3 }
 0x145   :  { %p388_p9 = pnand %p386_p8, %p383_p7 }
 0x147   :  { %391 = shalt.err (!%p388_p9)
}
 0x148   :  { %209 = dma.vmem_to_hbm [thread:$0]  %s207_s13, 128, %s491_s3, [#allocation5]  }
 0x149   :  { %396 = dma.done.wait [#allocation5], 128  }
 0x14a   :  { %397 = vsyncadd [#allocation5], 4294967168 }
 0x14b   :  { %213 = vsyncpa [#allocation4], 1 }
 0x14c   :  { %214 = vsyncpa [#allocation7], 1 }
 0x14d   :  { %215 = vsyncpa [#allocation5], 1 }

</bundles_post_ra>
